<compile_context>
chip_gen: v5e
topology: v5e:2x2
jax: 0.10.0
libtpu: 0.0.40
codegen_flags: <defaults>
</compile_context>

<pallas_src>
import jax
import jax.numpy as jnp
from jax.experimental import pallas as pl
from jax.experimental.pallas import tpu as pltpu


def autoencoder_kernel(x_ref,
                       w1_ref, b1_ref,
                       w2_ref, b2_ref,
                       w3_ref, b3_ref,
                       w4_ref, b4_ref,
                       out_ref):
    """One (bt, D) batch tile through the full encoder/decoder stack.

    x_ref  : (bt, D) activation tile. The block spans the full feature row, so the
             HBM<->VMEM DMA is fully contiguous (no transpose anywhere).
    w*_ref : pre-transposed weights (in_features, out_features), whole & resident.
    b*_ref : biases (1, out_features).
    """
    x = x_ref[...]

    # ---- encoder ----
    h = jnp.dot(x, w1_ref[...], preferred_element_type=jnp.float32)
    h = jnp.maximum(h + b1_ref[...].astype(jnp.float32), 0.0)
    # Dropout(0.2): identity in eval/inference mode.
    # TODO(synk): add stochastic dropout via pltpu.prng_random_bits if training
    #             semantics (p=0.2 with 1/(1-p) scaling) are required.
    h = jnp.dot(h.astype(w2_ref.dtype), w2_ref[...], preferred_element_type=jnp.float32)
    h = jnp.maximum(h + b2_ref[...].astype(jnp.float32), 0.0)

    # ---- decoder ----
    h = jnp.dot(h.astype(w3_ref.dtype), w3_ref[...], preferred_element_type=jnp.float32)
    h = jnp.maximum(h + b3_ref[...].astype(jnp.float32), 0.0)
    y = jnp.dot(h.astype(w4_ref.dtype), w4_ref[...], preferred_element_type=jnp.float32)
    y = y + b4_ref[...].astype(jnp.float32)

    out_ref[...] = y.astype(out_ref.dtype)


def autoencoder_forward(x, params, *, batch_tile=8192, min_steps=1):
    """x: (B, input_size). params: PyTorch-layout weights (out, in), biases (out,).

    batch_tile : max rows per grid step (multiple of 128). Default 8192 ->
                 4 MiB f32 in+out per step (8 MiB double-buffered), safely under
                 the default scoped VMEM on v5e/v6e/v7x. Raise (with
                 vmem_limit_bytes) on v6e if desired; keep <=16384 on v7x.
    min_steps  : set to 2 on v7x so both TensorCores get work at small B.
    """
    B, D = x.shape

    # Pre-transpose the tiny weights once (<=24 KiB total) so the kernel computes
    # x @ W^T without any activation transpose; biases broadcast as (1, out).
    w1t, b1 = params["w1"].T, params["b1"].reshape(1, -1)   # (D, 32), (1, 32)
    w2t, b2 = params["w2"].T, params["b2"].reshape(1, -1)   # (32, 16), (1, 16)
    w3t, b3 = params["w3"].T, params["b3"].reshape(1, -1)   # (16, 32), (1, 32)
    w4t, b4 = params["w4"].T, params["b4"].reshape(1, -1)   # (32, D), (1, D)

    # --- tile-size selection (no overshoot) ---
    # Pad the batch only to a multiple of 128 (sublane tiling), then split those
    # 128-row blocks as evenly as possible over the grid steps.
    B128 = pl.cdiv(B, 128) * 128
    bt_cap = max(128, (min(batch_tile, B128) // 128) * 128)
    n_steps = max(min_steps, pl.cdiv(B128, bt_cap))
    bt = pl.cdiv(B128 // 128, n_steps) * 128
    Bp = n_steps * bt

    xp = x if Bp == B else jnp.pad(x, ((0, Bp - B), (0, 0)))

    def whole(a):
        # Weights / biases are tiny: keep them whole & resident across the grid.
        return pl.BlockSpec(a.shape, lambda i, _nd=a.ndim: (0,) * _nd)

    io_bytes = jnp.dtype(x.dtype).itemsize
    weight_bytes = sum(int(p.size) * jnp.dtype(p.dtype).itemsize
                       for p in (w1t, b1, w2t, b2, w3t, b3, w4t, b4))
    cost = pl.CostEstimate(
        flops=2 * Bp * (D * 32 + 32 * 16 + 16 * 32 + 32 * D),
        transcendentals=0,
        bytes_accessed=Bp * D * io_bytes          # input read
                       + Bp * D * io_bytes        # output write
                       + weight_bytes,
    )

    out = pl.pallas_call(
        autoencoder_kernel,
        out_shape=jax.ShapeDtypeStruct((Bp, D), x.dtype),
        grid_spec=pltpu.PrefetchScalarGridSpec(
            num_scalar_prefetch=0,
            grid=(n_steps,),
            in_specs=[
                pl.BlockSpec((bt, D), lambda i: (i, 0)),   # contiguous row tile
                whole(w1t), whole(b1),
                whole(w2t), whole(b2),
                whole(w3t), whole(b3),
                whole(w4t), whole(b4),
            ],
            out_specs=pl.BlockSpec((bt, D), lambda i: (i, 0)),
        ),
        compiler_params=pltpu.CompilerParams(
            # Batch tiles are independent -> shard steps across both v7x TensorCores.
            dimension_semantics=("parallel",)),
        cost_estimate=cost,
    )(xp, w1t, b1, w2t, b2, w3t, b3, w4t, b4)

    return out if Bp == B else out[:B]


def init_params(key, input_size, dtype=jnp.float32):
    """Deterministic init matching PyTorch nn.Linear: weight (out, in), bias (out,)."""
    ks = jax.random.split(key, 8)

    def linear(kw, kb, fan_in, fan_out):
        bound = 1.0 / jnp.sqrt(fan_in)
        w = jax.random.uniform(kw, (fan_out, fan_in), jnp.float32, -bound, bound)
        b = jax.random.uniform(kb, (fan_out,), jnp.float32, -bound, bound)
        return w.astype(dtype), b.astype(dtype)

    w1, b1 = linear(ks[0], ks[1], input_size, 32)
    w2, b2 = linear(ks[2], ks[3], 32, 16)
    w3, b3 = linear(ks[4], ks[5], 16, 32)
    w4, b4 = linear(ks[6], ks[7], 32, input_size)
    return dict(w1=w1, b1=b1, w2=w2, b2=b2, w3=w3, b3=b3, w4=w4, b4=b4)


def reference_forward(x, p):
    p32 = {k: v.astype(jnp.float32) for k, v in p.items()}
    x = x.astype(jnp.float32)
    h = jnp.maximum(x @ p32["w1"].T + p32["b1"], 0.0)
    h = jnp.maximum(h @ p32["w2"].T + p32["b2"], 0.0)
    h = jnp.maximum(h @ p32["w3"].T + p32["b3"], 0.0)
    return h @ p32["w4"].T + p32["b4"]


if __name__ == "__main__":
    input_size = 64

    key = jax.random.PRNGKey(0)
    k_x1, k_x2, k_x3, k_p = jax.random.split(key, 4)
    params = init_params(k_p, input_size)

    # Small batch (single grid step, 16 rows padded to 128).
    x_small = jax.random.normal(k_x1, (16, input_size), jnp.float32)
    out_small = jax.block_until_ready(autoencoder_forward(x_small, params))
    ref_small = reference_forward(x_small, params)
    assert out_small.shape == x_small.shape
    assert jnp.allclose(out_small, ref_small, atol=1e-4, rtol=1e-4), "mismatch (small)"

    # Batch not a multiple of 128, forced multi-step grid (exercises tiling + padding).
    x_odd = jax.random.normal(k_x2, (200, input_size), jnp.float32)
    out_odd = jax.block_until_ready(
        autoencoder_forward(x_odd, params, batch_tile=128))
    ref_odd = reference_forward(x_odd, params)
    assert out_odd.shape == x_odd.shape
    assert jnp.allclose(out_odd, ref_odd, atol=1e-4, rtol=1e-4), "mismatch (odd batch)"

    # bf16 I/O path (halved HBM traffic): bf16 activations + bf16 weights,
    # f32 accumulation inside the kernel. Looser tolerance vs f32 reference.
    params_bf16 = {k: v.astype(jnp.bfloat16) for k, v in params.items()}
    x_bf16 = jax.random.normal(k_x3, (300, input_size), jnp.float32).astype(jnp.bfloat16)
    out_bf16 = jax.block_until_ready(autoencoder_forward(x_bf16, params_bf16))
    ref_bf16 = reference_forward(x_bf16, params_bf16)
    assert out_bf16.shape == x_bf16.shape and out_bf16.dtype == jnp.bfloat16
    assert jnp.allclose(out_bf16.astype(jnp.float32), ref_bf16, atol=1e-1, rtol=1e-1), \
        "mismatch (bf16)"

    print("KERNEL_OK")
</pallas_src>

<mosaic_0001>
module attributes {stable_mosaic.version = 11 : i64} {
  func.func @autoencoder_kernel(%arg0: i32, %arg1: memref<128x64xf32, #tpu.memory_space<vmem>>, %arg2: memref<64x32xf32, #tpu.memory_space<vmem>>, %arg3: memref<1x32xf32, #tpu.memory_space<vmem>>, %arg4: memref<32x16xf32, #tpu.memory_space<vmem>>, %arg5: memref<1x16xf32, #tpu.memory_space<vmem>>, %arg6: memref<16x32xf32, #tpu.memory_space<vmem>>, %arg7: memref<1x32xf32, #tpu.memory_space<vmem>>, %arg8: memref<32x64xf32, #tpu.memory_space<vmem>>, %arg9: memref<1x64xf32, #tpu.memory_space<vmem>>, %arg10: memref<128x64xf32, #tpu.memory_space<vmem>>) attributes {dimension_semantics = [#tpu.dimension_semantics<parallel>], iteration_bounds = array<i64: 1>, scalar_prefetch = 0 : i64, scratch_operands = 0 : i64, tpu.core_type = #tpu.core_type<tc>, window_params = [{transform_indices = @transform_0, window_bounds = array<i64: 128, 64>}, {pipeline_mode = #tpu.pipeline_mode<synchronous>, transform_indices = @transform_1, window_bounds = array<i64: 64, 32>}, {pipeline_mode = #tpu.pipeline_mode<synchronous>, transform_indices = @transform_2, window_bounds = array<i64: 1, 32>}, {pipeline_mode = #tpu.pipeline_mode<synchronous>, transform_indices = @transform_3, window_bounds = array<i64: 32, 16>}, {pipeline_mode = #tpu.pipeline_mode<synchronous>, transform_indices = @transform_4, window_bounds = array<i64: 1, 16>}, {pipeline_mode = #tpu.pipeline_mode<synchronous>, transform_indices = @transform_5, window_bounds = array<i64: 16, 32>}, {pipeline_mode = #tpu.pipeline_mode<synchronous>, transform_indices = @transform_6, window_bounds = array<i64: 1, 32>}, {pipeline_mode = #tpu.pipeline_mode<synchronous>, transform_indices = @transform_7, window_bounds = array<i64: 32, 64>}, {pipeline_mode = #tpu.pipeline_mode<synchronous>, transform_indices = @transform_8, window_bounds = array<i64: 1, 64>}, {transform_indices = @transform_9, window_bounds = array<i64: 128, 64>}]} {
    %c0 = arith.constant 0 : index
    %c0_0 = arith.constant 0 : index
    %0 = vector.load %arg1[%c0, %c0_0] : memref<128x64xf32, #tpu.memory_space<vmem>>, vector<128x64xf32>
    %c0_1 = arith.constant 0 : index
    %c0_2 = arith.constant 0 : index
    %1 = vector.load %arg2[%c0_1, %c0_2] : memref<64x32xf32, #tpu.memory_space<vmem>>, vector<64x32xf32>
    %cst = arith.constant dense<0.000000e+00> : vector<128x32xf32>
    %2 = tpu.matmul %0, %1, %cst {dimension_numbers = #tpu.dot_dimension_numbers<[1], [0], [0], [1], [0, 0, 1, 1], [], []>} : vector<128x64xf32>, vector<64x32xf32>, vector<128x32xf32> -> vector<128x32xf32>
    %c0_3 = arith.constant 0 : index
    %c0_4 = arith.constant 0 : index
    %3 = vector.load %arg3[%c0_3, %c0_4] : memref<1x32xf32, #tpu.memory_space<vmem>>, vector<1x32xf32>
    %4 = vector.broadcast %3 : vector<1x32xf32> to vector<128x32xf32>
    %5 = arith.addf %2, %4 : vector<128x32xf32>
    %cst_5 = arith.constant 0.000000e+00 : f32
    %6 = vector.broadcast %cst_5 : f32 to vector<128x32xf32>
    %7 = arith.maximumf %5, %6 : vector<128x32xf32>
    %c0_6 = arith.constant 0 : index
    %c0_7 = arith.constant 0 : index
    %8 = vector.load %arg4[%c0_6, %c0_7] : memref<32x16xf32, #tpu.memory_space<vmem>>, vector<32x16xf32>
    %cst_8 = arith.constant dense<0.000000e+00> : vector<128x16xf32>
    %9 = tpu.matmul %7, %8, %cst_8 {dimension_numbers = #tpu.dot_dimension_numbers<[1], [0], [0], [1], [0, 0, 1, 1], [], []>} : vector<128x32xf32>, vector<32x16xf32>, vector<128x16xf32> -> vector<128x16xf32>
    %c0_9 = arith.constant 0 : index
    %c0_10 = arith.constant 0 : index
    %10 = vector.load %arg5[%c0_9, %c0_10] : memref<1x16xf32, #tpu.memory_space<vmem>>, vector<1x16xf32>
    %11 = vector.broadcast %10 : vector<1x16xf32> to vector<128x16xf32>
    %12 = arith.addf %9, %11 : vector<128x16xf32>
    %cst_11 = arith.constant 0.000000e+00 : f32
    %13 = vector.broadcast %cst_11 : f32 to vector<128x16xf32>
    %14 = arith.maximumf %12, %13 : vector<128x16xf32>
    %c0_12 = arith.constant 0 : index
    %c0_13 = arith.constant 0 : index
    %15 = vector.load %arg6[%c0_12, %c0_13] : memref<16x32xf32, #tpu.memory_space<vmem>>, vector<16x32xf32>
    %cst_14 = arith.constant dense<0.000000e+00> : vector<128x32xf32>
    %16 = tpu.matmul %14, %15, %cst_14 {dimension_numbers = #tpu.dot_dimension_numbers<[1], [0], [0], [1], [0, 0, 1, 1], [], []>} : vector<128x16xf32>, vector<16x32xf32>, vector<128x32xf32> -> vector<128x32xf32>
    %c0_15 = arith.constant 0 : index
    %c0_16 = arith.constant 0 : index
    %17 = vector.load %arg7[%c0_15, %c0_16] : memref<1x32xf32, #tpu.memory_space<vmem>>, vector<1x32xf32>
    %18 = vector.broadcast %17 : vector<1x32xf32> to vector<128x32xf32>
    %19 = arith.addf %16, %18 : vector<128x32xf32>
    %cst_17 = arith.constant 0.000000e+00 : f32
    %20 = vector.broadcast %cst_17 : f32 to vector<128x32xf32>
    %21 = arith.maximumf %19, %20 : vector<128x32xf32>
    %c0_18 = arith.constant 0 : index
    %c0_19 = arith.constant 0 : index
    %22 = vector.load %arg8[%c0_18, %c0_19] : memref<32x64xf32, #tpu.memory_space<vmem>>, vector<32x64xf32>
    %cst_20 = arith.constant dense<0.000000e+00> : vector<128x64xf32>
    %23 = tpu.matmul %21, %22, %cst_20 {dimension_numbers = #tpu.dot_dimension_numbers<[1], [0], [0], [1], [0, 0, 1, 1], [], []>} : vector<128x32xf32>, vector<32x64xf32>, vector<128x64xf32> -> vector<128x64xf32>
    %c0_21 = arith.constant 0 : index
    %c0_22 = arith.constant 0 : index
    %24 = vector.load %arg9[%c0_21, %c0_22] : memref<1x64xf32, #tpu.memory_space<vmem>>, vector<1x64xf32>
    %25 = vector.broadcast %24 : vector<1x64xf32> to vector<128x64xf32>
    %26 = arith.addf %23, %25 : vector<128x64xf32>
    %c0_23 = arith.constant 0 : index
    %c0_24 = arith.constant 0 : index
    %27 = vector.load %arg10[%c0_23, %c0_24] : memref<128x64xf32, #tpu.memory_space<vmem>>, vector<128x64xf32>
    tpu.vector_store %arg10[%c0_23, %c0_24], %26 {strides = array<i32>} : memref<128x64xf32, #tpu.memory_space<vmem>>, vector<128x64xf32>,
    return
  }
  func.func @transform_0(%arg0: i32) -> (i32, i32) {
    %c0_i32 = arith.constant 0 : i32
    %c0_i32_0 = arith.constant 0 : i32
    return %arg0, %c0_i32 : i32, i32
  }
  func.func @transform_1(%arg0: i32) -> (i32, i32) {
    %c0_i32 = arith.constant 0 : i32
    %c0_i32_0 = arith.constant 0 : i32
    %c0_i32_1 = arith.constant 0 : i32
    return %c0_i32, %c0_i32_0 : i32, i32
  }
  func.func @transform_2(%arg0: i32) -> (i32, i32) {
    %c0_i32 = arith.constant 0 : i32
    %c0_i32_0 = arith.constant 0 : i32
    %c0_i32_1 = arith.constant 0 : i32
    return %c0_i32, %c0_i32_0 : i32, i32
  }
  func.func @transform_3(%arg0: i32) -> (i32, i32) {
    %c0_i32 = arith.constant 0 : i32
    %c0_i32_0 = arith.constant 0 : i32
    %c0_i32_1 = arith.constant 0 : i32
    return %c0_i32, %c0_i32_0 : i32, i32
  }
  func.func @transform_4(%arg0: i32) -> (i32, i32) {
    %c0_i32 = arith.constant 0 : i32
    %c0_i32_0 = arith.constant 0 : i32
    %c0_i32_1 = arith.constant 0 : i32
    return %c0_i32, %c0_i32_0 : i32, i32
  }
  func.func @transform_5(%arg0: i32) -> (i32, i32) {
    %c0_i32 = arith.constant 0 : i32
    %c0_i32_0 = arith.constant 0 : i32
    %c0_i32_1 = arith.constant 0 : i32
    return %c0_i32, %c0_i32_0 : i32, i32
  }
  func.func @transform_6(%arg0: i32) -> (i32, i32) {
    %c0_i32 = arith.constant 0 : i32
    %c0_i32_0 = arith.constant 0 : i32
    %c0_i32_1 = arith.constant 0 : i32
    return %c0_i32, %c0_i32_0 : i32, i32
  }
  func.func @transform_7(%arg0: i32) -> (i32, i32) {
    %c0_i32 = arith.constant 0 : i32
    %c0_i32_0 = arith.constant 0 : i32
    %c0_i32_1 = arith.constant 0 : i32
    return %c0_i32, %c0_i32_0 : i32, i32
  }
  func.func @transform_8(%arg0: i32) -> (i32, i32) {
    %c0_i32 = arith.constant 0 : i32
    %c0_i32_0 = arith.constant 0 : i32
    %c0_i32_1 = arith.constant 0 : i32
    return %c0_i32, %c0_i32_0 : i32, i32
  }
  func.func @transform_9(%arg0: i32) -> (i32, i32) {
    %c0_i32 = arith.constant 0 : i32
    %c0_i32_0 = arith.constant 0 : i32
    return %arg0, %c0_i32 : i32, i32
  }
}

</mosaic_0001>

<bundles_post_ra>
// kernel: tpu_custom_call.1
= control target key start
LH: loop header
LB: loop body
LE: loop exit
PB: predicated region body
PF: predicated region fallthrough
CT: control target
= control target key end

     0   :  { %vm60_vm0 = vcmask 523264   ;;  %vm198_vm1 = vcmask 261120   ;;  %vm334_vm2 = vcmask 130048   ;;  %s1019_s1 = inlined_call_operand.vmem [shape: f32[64,32], index: 1, kind: input, shape index: {}]   ;;  %s1020_s2 = inlined_call_operand.vmem [shape: f32[1,32], index: 2, kind: input, shape index: {}]   ;;  %s1021_s0 = inlined_call_operand.vmem [shape: f32[128,64], index: 0, kind: input, shape index: {}]   ;;  %s1022_s3 = inlined_call_operand.vmem [shape: f32[32,16], index: 3, kind: input, shape index: {}]   ;;  %s1023_s4 = inlined_call_operand.vmem [shape: f32[1,16], index: 4, kind: input, shape index: {}]   ;;  %s1024_s5 = inlined_call_operand.vmem [shape: f32[16,32], index: 5, kind: input, shape index: {}]   ;;  %s1025_s6 = inlined_call_operand.vmem [shape: f32[1,32], index: 6, kind: input, shape index: {}]   ;;  %s1026_s7 = inlined_call_operand.vmem [shape: f32[32,64], index: 7, kind: input, shape index: {}]   ;;  %s1027_s8 = inlined_call_operand.vmem [shape: f32[1,64], index: 8, kind: input, shape index: {}]   ;;  %s1028_s9 = inlined_call_operand.vmem [shape: f32[128,64], index: 9, kind: output, shape index: {}]  }
   0x1   :  { %v55_v0 = vld [vmem:[%s1019_s1 + $0x38] sm:$0xff]  ;;  %v54_v1 = vld [vmem:[%s1019_s1 + $0x30] sm:$0xff]  ;;  %v53_v2 = vld [vmem:[%s1019_s1 + $0x28] sm:$0xff] }
   0x2   :  { %117 = vmatpush.msra.mxu0 %v55_v0  ;;  %v52_v3 = vld [vmem:[%s1019_s1 + $0x20] sm:$0xff]  ;;  %v51_v4 = vld [vmem:[%s1019_s1 + $0x18] sm:$0xff]  ;;  %v50_v5 = vld [vmem:[%s1019_s1 + $0x10] sm:$0xff] }
   0x3   :  { %v49_v6 = vld [vmem:[%s1019_s1 + $0x8] sm:$0xff]  ;;  %v48_v7 = vld [vmem:[%s1019_s1] sm:$0xff]  ;;  %v34_v10 = vld [vmem:[%s1021_s0 + $0x10] sm:$0xff] }
   0x4   :  { %118 = vmatpush.msra.mxu0 %v54_v1  ;;  %v32_v8 = vld [vmem:[%s1021_s0] sm:$0xff]  ;;  %v33_v9 = vld [vmem:[%s1021_s0 + $0x8] sm:$0xff]  ;;  %v35_v11 = vld [vmem:[%s1021_s0 + $0x18] sm:$0xff] }
   0x5   :  { %v36_v12 = vld [vmem:[%s1021_s0 + $0x20] sm:$0xff]  ;;  %v37_v13 = vld [vmem:[%s1021_s0 + $0x28] sm:$0xff]  ;;  %v38_v14 = vld [vmem:[%s1021_s0 + $0x30] sm:$0xff] }
   0x6   :  { %119 = vmatpush.msra.mxu0 %v53_v2  ;;  %v39_v15 = vld [vmem:[%s1021_s0 + $0x38] sm:$0xff]  ;;  %v40_v16 = vld [vmem:[%s1021_s0 + $0x40] sm:$0xff]  ;;  %v41_v17 = vld [vmem:[%s1021_s0 + $0x48] sm:$0xff] }
   0x7   :  { %v42_v18 = vld [vmem:[%s1021_s0 + $0x50] sm:$0xff]  ;;  %v43_v19 = vld [vmem:[%s1021_s0 + $0x58] sm:$0xff]  ;;  %v44_v22 = vld [vmem:[%s1021_s0 + $0x60] sm:$0xff] }
   0x8   :  { %120 = vmatpush.msra.mxu0 %v52_v3  ;;  %v193_v20 = vld [vmem:[%s1022_s3 + $0x18] sm:$0xff]  ;;  %v192_v21 = vld [vmem:[%s1022_s3 + $0x10] sm:$0xff]  ;;  %v191_v23 = vld [vmem:[%s1022_s3 + $0x8] sm:$0xff] }
   0x9   :  { %259 = vmatpush.msra.mxu1 %v193_v20  ;;  %v190_v24 = vld [vmem:[%s1022_s3] sm:$0xff]  ;;  %v45_v25 = vld [vmem:[%s1021_s0 + $0x68] sm:$0xff]  ;;  %v46_v26 = vld [vmem:[%s1021_s0 + $0x70] sm:$0xff] }
   0xa   :  { %121 = vmatpush.msra.mxu0 %v51_v4  ;;  %v47_v27 = vld [vmem:[%s1021_s0 + $0x78] sm:$0xff]  ;;  %v826_v28 = vld [vmem:[%s1020_s2] ss:$0 sm:$0xff]  ;;  %v329_v4 = vld [vmem:[%s1024_s5 + $0x8] sm:$0xff] }
   0xb   :  { %260 = vmatpush.msra.mxu1 %v192_v21  ;;  %397 = vmatpush.msra.mxu2 %v329_v4  ;;  %v918_v4 = vld [vmem:[%s1025_s6] ss:$0 sm:$0xff] }
   0xc   :  { %122 = vmatpush.msra.mxu0 %v50_v5  ;;  %v328_v5 = vld [vmem:[%s1024_s5] sm:$0xff] }
   0xd   :  { %261 = vmatpush.msra.mxu1 %v191_v23  ;;  %398 = vmatpush.msra.mxu2 %v328_v5 }
   0xe   :  { %123 = vmatpush.msra.mxu0 %v49_v6 }
   0xf   :  { %262 = vmatpush.msra.mxu1 %v190_v24 }
  0x10   :  { %124 = vmatpush.msra.mxu0 %v48_v7 }
  0x11   :  { %605 = vmatmul.msk.f32.vlgmr.msra.gmra.mxu0 %vm60_vm0, %v32_v8 }
  0x19   :  { %606 = vmatmul.msk.f32.gmra.mxu0 %vm60_vm0, %v33_v9 }
  0x21   :  { %607 = vmatmul.msk.f32.gmra.mxu0 %vm60_vm0, %v34_v10 }
  0x29   :  { %608 = vmatmul.msk.f32.gmra.mxu0 %vm60_vm0, %v35_v11 }
  0x31   :  { %609 = vmatmul.msk.f32.gmra.mxu0 %vm60_vm0, %v36_v12 }
  0x39   :  { %610 = vmatmul.msk.f32.gmra.mxu0 %vm60_vm0, %v37_v13 }
  0x41   :  { %611 = vmatmul.msk.f32.gmra.mxu0 %vm60_vm0, %v38_v14 }
  0x49   :  { %612 = vmatmul.msk.f32.gmra.mxu0 %vm60_vm0, %v39_v15  ;;  %v869_v15 = vld [vmem:[%s1023_s4] ss:$0 sm:$0xff] }
  0x51   :  { %613 = vmatmul.msk.f32.gmra.mxu0 %vm60_vm0, %v40_v16 }
  0x59   :  { %614 = vmatmul.msk.f32.gmra.mxu0 %vm60_vm0, %v41_v17 }
  0x61   :  { %615 = vmatmul.msk.f32.gmra.mxu0 %vm60_vm0, %v42_v18 }
  0x69   :  { %616 = vmatmul.msk.f32.gmra.mxu0 %vm60_vm0, %v43_v19 }
  0x71   :  { %617 = vmatmul.msk.f32.gmra.mxu0 %vm60_vm0, %v44_v22 }
  0x79   :  { %618 = vmatmul.msk.f32.gmra.mxu0 %vm60_vm0, %v45_v25 }
  0x81   :  { %619 = vmatmul.msk.f32.gmra.mxu0 %vm60_vm0, %v46_v26 }
  0x89   :  { %620 = vmatmul.msk.f32.gmra.mxu0 %vm60_vm0, %v47_v27 }
  0x8e   :  { %v126_v29 = vpop.f32.mrf.mxu0 }
  0x8f   :  { %v127_v30 = vadd.f32 %v826_v28, %v126_v29 }
  0x91   :  { %v174_v31 = vmax.f32 %v127_v30, 0.0 }
  0x93   :  { %621 = vmatmul.msk.f32.vlgmr.msra.gmra.mxu1 %vm198_vm1, %v174_v31 }
  0x96   :  { %v129_v32 = vpop.f32.mrf.mxu0 }
  0x97   :  { %v130_v33 = vadd.f32 %v826_v28, %v129_v32 }
  0x99   :  { %v175_v34 = vmax.f32 %v130_v33, 0.0 }
  0x9b   :  { %622 = vmatmul.msk.f32.gmra.mxu1 %vm198_vm1, %v175_v34 }
  0x9e   :  { %v132_v35 = vpop.f32.mrf.mxu0 }
  0x9f   :  { %v133_v36 = vadd.f32 %v826_v28, %v132_v35 }
  0xa1   :  { %v176_v37 = vmax.f32 %v133_v36, 0.0 }
  0xa3   :  { %623 = vmatmul.msk.f32.gmra.mxu1 %vm198_vm1, %v176_v37 }
  0xa6   :  { %v135_v38 = vpop.f32.mrf.mxu0 }
  0xa7   :  { %v136_v39 = vadd.f32 %v826_v28, %v135_v38 }
  0xa9   :  { %v177_v40 = vmax.f32 %v136_v39, 0.0 }
  0xab   :  { %624 = vmatmul.msk.f32.gmra.mxu1 %vm198_vm1, %v177_v40 }
  0xae   :  { %v138_v41 = vpop.f32.mrf.mxu0 }
  0xaf   :  { %v139_v42 = vadd.f32 %v826_v28, %v138_v41 }
  0xb1   :  { %v178_v43 = vmax.f32 %v139_v42, 0.0 }
  0xb3   :  { %625 = vmatmul.msk.f32.gmra.mxu1 %vm198_vm1, %v178_v43 }
  0xb6   :  { %v141_v44 = vpop.f32.mrf.mxu0 }
  0xb7   :  { %v142_v45 = vadd.f32 %v826_v28, %v141_v44 }
  0xb9   :  { %v179_v46 = vmax.f32 %v142_v45, 0.0 }
  0xbb   :  { %626 = vmatmul.msk.f32.gmra.mxu1 %vm198_vm1, %v179_v46 }
  0xbe   :  { %v144_v47 = vpop.f32.mrf.mxu0 }
  0xbf   :  { %v145_v48 = vadd.f32 %v826_v28, %v144_v47 }
  0xc1   :  { %v180_v49 = vmax.f32 %v145_v48, 0.0 }
  0xc3   :  { %627 = vmatmul.msk.f32.gmra.mxu1 %vm198_vm1, %v180_v49 }
  0xc6   :  { %v147_v50 = vpop.f32.mrf.mxu0 }
  0xc7   :  { %v148_v51 = vadd.f32 %v826_v28, %v147_v50 }
  0xc9   :  { %v181_v52 = vmax.f32 %v148_v51, 0.0 }
  0xcb   :  { %628 = vmatmul.msk.f32.gmra.mxu1 %vm198_vm1, %v181_v52  ;;  %v467_v52 = vld [vmem:[%s1026_s7 + $0x18] sm:$0xff] }
  0xcc   :  { %532 = vmatpush.msra.mxu3 %v467_v52 }
  0xce   :  { %v150_v53 = vpop.f32.mrf.mxu0 }
  0xcf   :  { %v151_v54 = vadd.f32 %v826_v28, %v150_v53 }
  0xd1   :  { %v182_v55 = vmax.f32 %v151_v54, 0.0 }
  0xd3   :  { %629 = vmatmul.msk.f32.gmra.mxu1 %vm198_vm1, %v182_v55 }
  0xd6   :  { %v153_v56 = vpop.f32.mrf.mxu0 }
  0xd7   :  { %v154_v57 = vadd.f32 %v826_v28, %v153_v56  ;;  %v466_v56 = vld [vmem:[%s1026_s7 + $0x10] sm:$0xff] }
  0xd8   :  { %533 = vmatpush.msra.mxu3 %v466_v56 }
  0xd9   :  { %v183_v58 = vmax.f32 %v154_v57, 0.0 }
  0xdb   :  { %630 = vmatmul.msk.f32.gmra.mxu1 %vm198_vm1, %v183_v58 }
  0xde   :  { %v156_v59 = vpop.f32.mrf.mxu0 }
  0xdf   :  { %v157_v60 = vadd.f32 %v826_v28, %v156_v59  ;;  %v465_v59 = vld [vmem:[%s1026_s7 + $0x8] sm:$0xff] }
  0xe0   :  { %534 = vmatpush.msra.mxu3 %v465_v59 }
  0xe1   :  { %v184_v61 = vmax.f32 %v157_v60, 0.0 }
  0xe3   :  { %631 = vmatmul.msk.f32.gmra.mxu1 %vm198_vm1, %v184_v61  ;;  %v464_v61 = vld [vmem:[%s1026_s7] sm:$0xff] }
  0xe4   :  { %535 = vmatpush.msra.mxu3 %v464_v61 }
  0xe6   :  { %v159_v62 = vpop.f32.mrf.mxu0 }
  0xe7   :  { %v160_v63 = vadd.f32 %v826_v28, %v159_v62 }
  0xe9   :  { %v185_v0 = vmax.f32 %v160_v63, 0.0 }
  0xeb   :  { %632 = vmatmul.msk.f32.gmra.mxu1 %vm198_vm1, %v185_v0 }
  0xee   :  { %v162_v1 = vpop.f32.mrf.mxu0 }
  0xef   :  { %v163_v2 = vadd.f32 %v826_v28, %v162_v1 }
  0xf1   :  { %v186_v3 = vmax.f32 %v163_v2, 0.0 }
  0xf3   :  { %633 = vmatmul.msk.f32.gmra.mxu1 %vm198_vm1, %v186_v3 }
  0xf6   :  { %v165_v6 = vpop.f32.mrf.mxu0 }
  0xf7   :  { %v166_v7 = vadd.f32 %v826_v28, %v165_v6 }
  0xf9   :  { %v187_v8 = vmax.f32 %v166_v7, 0.0 }
  0xfb   :  { %634 = vmatmul.msk.f32.gmra.mxu1 %vm198_vm1, %v187_v8 }
  0xfe   :  { %v168_v9 = vpop.f32.mrf.mxu0 }
  0xff   :  { %v169_v10 = vadd.f32 %v826_v28, %v168_v9 }
 0x101   :  { %v188_v11 = vmax.f32 %v169_v10, 0.0 }
 0x103   :  { %635 = vmatmul.msk.f32.gmra.mxu1 %vm198_vm1, %v188_v11 }
 0x106   :  { %v171_v12 = vpop.f32.mrf.mxu0 }
 0x107   :  { %v172_v13 = vadd.f32 %v826_v28, %v171_v12 }
 0x109   :  { %v189_v14 = vmax.f32 %v172_v13, 0.0 }
 0x10b   :  { %636 = vmatmul.msk.f32.gmra.mxu1 %vm198_vm1, %v189_v14 }
 0x110   :  { %v264_v16 = vpop.f32.mrf.mxu1 }
 0x111   :  { %v265_v17 = vadd.f32 %v869_v15, %v264_v16 }
 0x113   :  { %v312_v18 = vmax.f32 %v265_v17, 0.0 }
 0x115   :  { %637 = vmatmul.msk.f32.vlgmr.msra.gmra.mxu2 %vm334_vm2, %v312_v18 }
 0x118   :  { %v267_v19 = vpop.f32.mrf.mxu1 }
 0x119   :  { %v268_v20 = vadd.f32 %v869_v15, %v267_v19 }
 0x11b   :  { %v313_v21 = vmax.f32 %v268_v20, 0.0 }
 0x11d   :  { %638 = vmatmul.msk.f32.gmra.mxu2 %vm334_vm2, %v313_v21 }
 0x120   :  { %v270_v22 = vpop.f32.mrf.mxu1 }
 0x121   :  { %v271_v23 = vadd.f32 %v869_v15, %v270_v22 }
 0x123   :  { %v314_v24 = vmax.f32 %v271_v23, 0.0 }
 0x125   :  { %639 = vmatmul.msk.f32.gmra.mxu2 %vm334_vm2, %v314_v24 }
 0x128   :  { %v273_v25 = vpop.f32.mrf.mxu1 }
 0x129   :  { %v274_v26 = vadd.f32 %v869_v15, %v273_v25 }
 0x12b   :  { %v315_v27 = vmax.f32 %v274_v26, 0.0 }
 0x12d   :  { %640 = vmatmul.msk.f32.gmra.mxu2 %vm334_vm2, %v315_v27 }
 0x130   :  { %v276_v28 = vpop.f32.mrf.mxu1 }
 0x131   :  { %v277_v29 = vadd.f32 %v869_v15, %v276_v28 }
 0x133   :  { %v316_v30 = vmax.f32 %v277_v29, 0.0 }
 0x135   :  { %641 = vmatmul.msk.f32.gmra.mxu2 %vm334_vm2, %v316_v30 }
 0x138   :  { %v279_v31 = vpop.f32.mrf.mxu1 }
 0x139   :  { %v280_v32 = vadd.f32 %v869_v15, %v279_v31 }
 0x13b   :  { %v317_v33 = vmax.f32 %v280_v32, 0.0 }
 0x13d   :  { %642 = vmatmul.msk.f32.gmra.mxu2 %vm334_vm2, %v317_v33 }
 0x140   :  { %v282_v34 = vpop.f32.mrf.mxu1 }
 0x141   :  { %v283_v35 = vadd.f32 %v869_v15, %v282_v34 }
 0x143   :  { %v318_v36 = vmax.f32 %v283_v35, 0.0 }
 0x145   :  { %643 = vmatmul.msk.f32.gmra.mxu2 %vm334_vm2, %v318_v36 }
 0x148   :  { %v285_v37 = vpop.f32.mrf.mxu1 }
 0x149   :  { %v286_v38 = vadd.f32 %v869_v15, %v285_v37 }
 0x14b   :  { %v319_v39 = vmax.f32 %v286_v38, 0.0 }
 0x14d   :  { %644 = vmatmul.msk.f32.gmra.mxu2 %vm334_vm2, %v319_v39 }
 0x150   :  { %v288_v40 = vpop.f32.mrf.mxu1 }
 0x151   :  { %v289_v41 = vadd.f32 %v869_v15, %v288_v40 }
 0x153   :  { %v320_v42 = vmax.f32 %v289_v41, 0.0 }
 0x155   :  { %645 = vmatmul.msk.f32.gmra.mxu2 %vm334_vm2, %v320_v42 }
 0x158   :  { %v291_v43 = vpop.f32.mrf.mxu1 }
 0x159   :  { %v292_v44 = vadd.f32 %v869_v15, %v291_v43 }
 0x15b   :  { %v321_v45 = vmax.f32 %v292_v44, 0.0 }
 0x15d   :  { %646 = vmatmul.msk.f32.gmra.mxu2 %vm334_vm2, %v321_v45 }
 0x160   :  { %v294_v46 = vpop.f32.mrf.mxu1 }
 0x161   :  { %v295_v47 = vadd.f32 %v869_v15, %v294_v46 }
 0x163   :  { %v322_v48 = vmax.f32 %v295_v47, 0.0 }
 0x165   :  { %647 = vmatmul.msk.f32.gmra.mxu2 %vm334_vm2, %v322_v48 }
 0x168   :  { %v297_v49 = vpop.f32.mrf.mxu1 }
 0x169   :  { %v298_v50 = vadd.f32 %v869_v15, %v297_v49 }
 0x16b   :  { %v323_v51 = vmax.f32 %v298_v50, 0.0 }
 0x16d   :  { %648 = vmatmul.msk.f32.gmra.mxu2 %vm334_vm2, %v323_v51 }
 0x170   :  { %v300_v53 = vpop.f32.mrf.mxu1 }
 0x171   :  { %v301_v54 = vadd.f32 %v869_v15, %v300_v53  ;;  %v672_v53 = vld [vmem:[%s1027_s8] ss:$0 sm:$0xff] }
 0x173   :  { %v324_v55 = vmax.f32 %v301_v54, 0.0 }
 0x175   :  { %649 = vmatmul.msk.f32.gmra.mxu2 %vm334_vm2, %v324_v55 }
 0x178   :  { %v303_v57 = vpop.f32.mrf.mxu1 }
 0x179   :  { %v304_v58 = vadd.f32 %v869_v15, %v303_v57 }
 0x17b   :  { %v325_v60 = vmax.f32 %v304_v58, 0.0 }
 0x17d   :  { %650 = vmatmul.msk.f32.gmra.mxu2 %vm334_vm2, %v325_v60 }
 0x180   :  { %v306_v62 = vpop.f32.mrf.mxu1 }
 0x181   :  { %v307_v63 = vadd.f32 %v869_v15, %v306_v62 }
 0x183   :  { %v326_v0 = vmax.f32 %v307_v63, 0.0 }
 0x185   :  { %651 = vmatmul.msk.f32.gmra.mxu2 %vm334_vm2, %v326_v0 }
 0x188   :  { %v309_v1 = vpop.f32.mrf.mxu1 }
 0x189   :  { %v310_v2 = vadd.f32 %v869_v15, %v309_v1 }
 0x18b   :  { %v327_v3 = vmax.f32 %v310_v2, 0.0 }
 0x18d   :  { %652 = vmatmul.msk.f32.gmra.mxu2 %vm334_vm2, %v327_v3 }
 0x198   :  { %v400_v5 = vpop.f32.mrf.mxu2 }
 0x199   :  { %v401_v6 = vadd.f32 %v918_v4, %v400_v5 }
 0x19b   :  { %v448_v7 = vmax.f32 %v401_v6, 0.0 }
 0x19d   :  { %653 = vmatmul.msk.f32.vlgmr.msra.gmra.mxu3 %vm198_vm1, %v448_v7 }
 0x1a0   :  { %v403_v8 = vpop.f32.mrf.mxu2 }
 0x1a1   :  { %v404_v9 = vadd.f32 %v918_v4, %v403_v8 }
 0x1a3   :  { %v449_v10 = vmax.f32 %v404_v9, 0.0 }
 0x1a5   :  { %654 = vmatmul.msk.f32.gmra.mxu3 %vm198_vm1, %v449_v10 }
 0x1a8   :  { %v406_v11 = vpop.f32.mrf.mxu2 }
 0x1a9   :  { %v407_v12 = vadd.f32 %v918_v4, %v406_v11 }
 0x1ab   :  { %v450_v13 = vmax.f32 %v407_v12, 0.0 }
 0x1ad   :  { %655 = vmatmul.msk.f32.gmra.mxu3 %vm198_vm1, %v450_v13 }
 0x1b0   :  { %v409_v14 = vpop.f32.mrf.mxu2 }
 0x1b1   :  { %v410_v15 = vadd.f32 %v918_v4, %v409_v14 }
 0x1b3   :  { %v451_v16 = vmax.f32 %v410_v15, 0.0 }
 0x1b5   :  { %656 = vmatmul.msk.f32.gmra.mxu3 %vm198_vm1, %v451_v16 }
 0x1b8   :  { %v412_v17 = vpop.f32.mrf.mxu2 }
 0x1b9   :  { %v413_v18 = vadd.f32 %v918_v4, %v412_v17 }
 0x1bb   :  { %v452_v19 = vmax.f32 %v413_v18, 0.0 }
 0x1bd   :  { %657 = vmatmul.msk.f32.gmra.mxu3 %vm198_vm1, %v452_v19 }
 0x1c0   :  { %v415_v20 = vpop.f32.mrf.mxu2 }
 0x1c1   :  { %v416_v21 = vadd.f32 %v918_v4, %v415_v20 }
 0x1c3   :  { %v453_v22 = vmax.f32 %v416_v21, 0.0 }
 0x1c5   :  { %658 = vmatmul.msk.f32.gmra.mxu3 %vm198_vm1, %v453_v22 }
 0x1c8   :  { %v418_v23 = vpop.f32.mrf.mxu2 }
 0x1c9   :  { %v419_v24 = vadd.f32 %v918_v4, %v418_v23 }
 0x1cb   :  { %v454_v25 = vmax.f32 %v419_v24, 0.0 }
 0x1cd   :  { %659 = vmatmul.msk.f32.gmra.mxu3 %vm198_vm1, %v454_v25 }
 0x1d0   :  { %v421_v26 = vpop.f32.mrf.mxu2 }
 0x1d1   :  { %v422_v27 = vadd.f32 %v918_v4, %v421_v26 }
 0x1d3   :  { %v455_v28 = vmax.f32 %v422_v27, 0.0 }
 0x1d5   :  { %660 = vmatmul.msk.f32.gmra.mxu3 %vm198_vm1, %v455_v28 }
 0x1d8   :  { %v424_v29 = vpop.f32.mrf.mxu2 }
 0x1d9   :  { %v425_v30 = vadd.f32 %v918_v4, %v424_v29 }
 0x1db   :  { %v456_v31 = vmax.f32 %v425_v30, 0.0 }
 0x1dd   :  { %661 = vmatmul.msk.f32.gmra.mxu3 %vm198_vm1, %v456_v31 }
 0x1e0   :  { %v427_v32 = vpop.f32.mrf.mxu2 }
 0x1e1   :  { %v428_v33 = vadd.f32 %v918_v4, %v427_v32 }
 0x1e3   :  { %v457_v34 = vmax.f32 %v428_v33, 0.0 }
 0x1e5   :  { %662 = vmatmul.msk.f32.gmra.mxu3 %vm198_vm1, %v457_v34 }
 0x1e8   :  { %v430_v35 = vpop.f32.mrf.mxu2 }
 0x1e9   :  { %v431_v36 = vadd.f32 %v918_v4, %v430_v35 }
 0x1eb   :  { %v458_v37 = vmax.f32 %v431_v36, 0.0 }
 0x1ed   :  { %663 = vmatmul.msk.f32.gmra.mxu3 %vm198_vm1, %v458_v37 }
 0x1f0   :  { %v433_v38 = vpop.f32.mrf.mxu2 }
 0x1f1   :  { %v434_v39 = vadd.f32 %v918_v4, %v433_v38 }
 0x1f3   :  { %v459_v40 = vmax.f32 %v434_v39, 0.0 }
 0x1f5   :  { %664 = vmatmul.msk.f32.gmra.mxu3 %vm198_vm1, %v459_v40 }
 0x1f8   :  { %v436_v41 = vpop.f32.mrf.mxu2 }
 0x1f9   :  { %v437_v42 = vadd.f32 %v918_v4, %v436_v41 }
 0x1fb   :  { %v460_v43 = vmax.f32 %v437_v42, 0.0 }
 0x1fd   :  { %665 = vmatmul.msk.f32.gmra.mxu3 %vm198_vm1, %v460_v43 }
 0x200   :  { %v439_v44 = vpop.f32.mrf.mxu2 }
 0x201   :  { %v440_v45 = vadd.f32 %v918_v4, %v439_v44 }
 0x203   :  { %v461_v46 = vmax.f32 %v440_v45, 0.0 }
 0x205   :  { %666 = vmatmul.msk.f32.gmra.mxu3 %vm198_vm1, %v461_v46 }
 0x208   :  { %v442_v47 = vpop.f32.mrf.mxu2 }
 0x209   :  { %v443_v48 = vadd.f32 %v918_v4, %v442_v47 }
 0x20b   :  { %v462_v49 = vmax.f32 %v443_v48, 0.0 }
 0x20d   :  { %667 = vmatmul.msk.f32.gmra.mxu3 %vm198_vm1, %v462_v49 }
 0x210   :  { %v445_v50 = vpop.f32.mrf.mxu2 }
 0x211   :  { %v446_v51 = vadd.f32 %v918_v4, %v445_v50 }
 0x213   :  { %v463_v52 = vmax.f32 %v446_v51, 0.0 }
 0x215   :  { %668 = vmatmul.msk.f32.gmra.mxu3 %vm198_vm1, %v463_v52 }
 0x220   :  { %v537_v54 = vpop.f32.mrf.mxu3 }
 0x221   :  { %v538_v55 = vadd.f32 %v672_v53, %v537_v54 }
 0x223   :  { %585 = vst.msk [vmem:[%s1028_s9] sm:$0xff] %vm60_vm0, %v538_v55 }
 0x228   :  { %v540_v56 = vpop.f32.mrf.mxu3 }
 0x229   :  { %v541_v57 = vadd.f32 %v672_v53, %v540_v56 }
 0x22b   :  { %586 = vst.msk [vmem:[%s1028_s9 + $0x8] sm:$0xff] %vm60_vm0, %v541_v57 }
 0x230   :  { %v543_v58 = vpop.f32.mrf.mxu3 }
 0x231   :  { %v544_v59 = vadd.f32 %v672_v53, %v543_v58 }
 0x233   :  { %587 = vst.msk [vmem:[%s1028_s9 + $0x10] sm:$0xff] %vm60_vm0, %v544_v59 }
 0x238   :  { %v546_v60 = vpop.f32.mrf.mxu3 }
 0x239   :  { %v547_v61 = vadd.f32 %v672_v53, %v546_v60 }
 0x23b   :  { %588 = vst.msk [vmem:[%s1028_s9 + $0x18] sm:$0xff] %vm60_vm0, %v547_v61 }
 0x240   :  { %v549_v62 = vpop.f32.mrf.mxu3 }
 0x241   :  { %v550_v63 = vadd.f32 %v672_v53, %v549_v62 }
 0x243   :  { %589 = vst.msk [vmem:[%s1028_s9 + $0x20] sm:$0xff] %vm60_vm0, %v550_v63 }
 0x248   :  { %v552_v0 = vpop.f32.mrf.mxu3 }
 0x249   :  { %v553_v1 = vadd.f32 %v672_v53, %v552_v0 }
 0x24b   :  { %590 = vst.msk [vmem:[%s1028_s9 + $0x28] sm:$0xff] %vm60_vm0, %v553_v1 }
 0x250   :  { %v555_v2 = vpop.f32.mrf.mxu3 }
 0x251   :  { %v556_v3 = vadd.f32 %v672_v53, %v555_v2 }
 0x253   :  { %591 = vst.msk [vmem:[%s1028_s9 + $0x30] sm:$0xff] %vm60_vm0, %v556_v3 }
 0x258   :  { %v558_v4 = vpop.f32.mrf.mxu3 }
 0x259   :  { %v559_v5 = vadd.f32 %v672_v53, %v558_v4 }
 0x25b   :  { %592 = vst.msk [vmem:[%s1028_s9 + $0x38] sm:$0xff] %vm60_vm0, %v559_v5 }
 0x260   :  { %v561_v6 = vpop.f32.mrf.mxu3 }
 0x261   :  { %v562_v7 = vadd.f32 %v672_v53, %v561_v6 }
 0x263   :  { %593 = vst.msk [vmem:[%s1028_s9 + $0x40] sm:$0xff] %vm60_vm0, %v562_v7 }
 0x268   :  { %v564_v8 = vpop.f32.mrf.mxu3 }
 0x269   :  { %v565_v9 = vadd.f32 %v672_v53, %v564_v8 }
 0x26b   :  { %594 = vst.msk [vmem:[%s1028_s9 + $0x48] sm:$0xff] %vm60_vm0, %v565_v9 }
 0x270   :  { %v567_v10 = vpop.f32.mrf.mxu3 }
 0x271   :  { %v568_v11 = vadd.f32 %v672_v53, %v567_v10 }
 0x273   :  { %595 = vst.msk [vmem:[%s1028_s9 + $0x50] sm:$0xff] %vm60_vm0, %v568_v11 }
 0x278   :  { %v570_v12 = vpop.f32.mrf.mxu3 }
 0x279   :  { %v571_v13 = vadd.f32 %v672_v53, %v570_v12 }
 0x27b   :  { %596 = vst.msk [vmem:[%s1028_s9 + $0x58] sm:$0xff] %vm60_vm0, %v571_v13 }
 0x280   :  { %v573_v14 = vpop.f32.mrf.mxu3 }
 0x281   :  { %v574_v15 = vadd.f32 %v672_v53, %v573_v14 }
 0x283   :  { %597 = vst.msk [vmem:[%s1028_s9 + $0x60] sm:$0xff] %vm60_vm0, %v574_v15 }
 0x288   :  { %v576_v16 = vpop.f32.mrf.mxu3 }
 0x289   :  { %v577_v17 = vadd.f32 %v672_v53, %v576_v16 }
 0x28b   :  { %598 = vst.msk [vmem:[%s1028_s9 + $0x68] sm:$0xff] %vm60_vm0, %v577_v17 }
 0x290   :  { %v579_v18 = vpop.f32.mrf.mxu3 }
 0x291   :  { %v580_v19 = vadd.f32 %v672_v53, %v579_v18 }
 0x293   :  { %599 = vst.msk [vmem:[%s1028_s9 + $0x70] sm:$0xff] %vm60_vm0, %v580_v19 }
 0x298   :  { %v582_v20 = vpop.f32.mrf.mxu3 }
 0x299   :  { %v583_v21 = vadd.f32 %v672_v53, %v582_v20 }
 0x29b   :  { %600 = vst.msk [vmem:[%s1028_s9 + $0x78] sm:$0xff] %vm60_vm0, %v583_v21 }

</bundles_post_ra>
